<compile_context>
chip_gen: v6e
topology: v6e:2x2x1
jax: 0.10.0
libtpu: 0.0.40
codegen_flags: <defaults>
</compile_context>

<pallas_src>
import jax
import jax.numpy as jnp
from jax.experimental import pallas as pl
from jax.experimental.pallas import tpu as pltpu


def _copy_kernel(x_ref, o_ref):
    # The output block squeezes the inserted size-1 axis away, so the kernel
    # sees identical shapes on both refs: one full-block VMEM copy.
    o_ref[...] = x_ref[...]


def unsqueeze_pallas(x, dim):
    """torch.unsqueeze(x, dim) as a single Pallas TPU kernel invocation."""
    ndim = x.ndim
    if dim < 0:
        dim += ndim + 1
    if not 0 <= dim <= ndim:
        raise ValueError(f"dim {dim} out of range for rank-{ndim} input")
    out_shape = x.shape[:dim] + (1,) + x.shape[dim:]

    in_spec = pl.BlockSpec(x.shape, lambda i: (0,) * ndim)

    if dim >= ndim - 1:
        # The new axis would land inside the (sublane, lane) tile of the output
        # and force an in-kernel relayout.  A trailing unit axis is pure
        # metadata: do the data movement in Pallas on the original layout and
        # insert the axis with a free reshape at the wrapper level.
        # TODO(synk): no in-kernel equivalent for inserting a unit axis into
        # the lane/sublane tile without a relayout; handled as metadata here.
        y = pl.pallas_call(
            _copy_kernel,
            out_shape=jax.ShapeDtypeStruct(x.shape, x.dtype),
            grid=(1,),
            in_specs=[in_spec],
            out_specs=pl.BlockSpec(x.shape, lambda i: (0,) * ndim),
            compiler_params=pltpu.CompilerParams(
                dimension_semantics=("arbitrary",)),
        )(x)
        return y.reshape(out_shape)

    # General case: inserted axis does not touch the last two (tiled) dims.
    # Express it as a squeezed (None) block dim in the output spec only.
    out_block = x.shape[:dim] + (None,) + x.shape[dim:]
    n_out = ndim + 1
    return pl.pallas_call(
        _copy_kernel,
        out_shape=jax.ShapeDtypeStruct(out_shape, x.dtype),
        grid=(1,),
        in_specs=[in_spec],
        out_specs=pl.BlockSpec(out_block, lambda i: (0,) * n_out),
        compiler_params=pltpu.CompilerParams(
            dimension_semantics=("arbitrary",)),
    )(x)


# Jitted entry point; `dim` is a static Python int (matches Unsqueezer(dim)).
forward = jax.jit(unsqueeze_pallas, static_argnums=(1,))


if __name__ == "__main__":
    key = jax.random.PRNGKey(0)
    B, C, H, W = 2, 4, 16, 16
    x = jax.random.normal(key, (B, C, H, W), dtype=jnp.float32)

    # Unsqueezer(dim=1).forward(x) == torch.unsqueeze(x, 1)
    dim = 1
    out = jax.block_until_ready(forward(x, dim))
    ref = jnp.expand_dims(x, dim)
    assert out.shape == ref.shape == (B, 1, C, H, W), out.shape
    assert jnp.array_equal(out, ref), "value mismatch at dim=1"

    # Extra coverage: other insertion positions, incl. negative / trailing.
    for d in (0, 2, -1):
        o = jax.block_until_ready(forward(x, d))
        r = jnp.expand_dims(x, d)
        assert o.shape == r.shape, (d, o.shape, r.shape)
        assert jnp.array_equal(o, r), f"value mismatch at dim={d}"

    print("KERNEL_OK")
</pallas_src>

<mosaic_0001>
module attributes {stable_mosaic.version = 11 : i64} {
  func.func @_copy_kernel(%arg0: i32, %arg1: memref<2x4x16x16xf32, #tpu.memory_space<vmem>>, %arg2: memref<2x1x4x16x16xf32, #tpu.memory_space<vmem>>) attributes {dimension_semantics = [#tpu.dimension_semantics<arbitrary>], iteration_bounds = array<i64: 1>, scalar_prefetch = 0 : i64, scratch_operands = 0 : i64, tpu.core_type = #tpu.core_type<tc>, window_params = [{pipeline_mode = #tpu.pipeline_mode<synchronous>, transform_indices = @transform_0, window_bounds = array<i64: 2, 4, 16, 16>}, {pipeline_mode = #tpu.pipeline_mode<synchronous>, transform_indices = @transform_1, window_bounds = array<i64: 2, 1, 4, 16, 16>}]} {
    %c0 = arith.constant 0 : index
    %c0_0 = arith.constant 0 : index
    %c0_1 = arith.constant 0 : index
    %c0_2 = arith.constant 0 : index
    %0 = vector.load %arg1[%c0, %c0_0, %c0_1, %c0_2] : memref<2x4x16x16xf32, #tpu.memory_space<vmem>>, vector<2x4x16x16xf32>
    %c0_3 = arith.constant 0 : index
    %c0_4 = arith.constant 0 : index
    %c0_5 = arith.constant 0 : index
    %c0_6 = arith.constant 0 : index
    %c0_7 = arith.constant 0 : index
    %1 = vector.load %arg2[%c0_3, %c0_4, %c0_5, %c0_6, %c0_7] : memref<2x1x4x16x16xf32, #tpu.memory_space<vmem>>, vector<2x1x4x16x16xf32>
    %2 = vector.shape_cast %1 : vector<2x1x4x16x16xf32> to vector<2x4x16x16xf32>
    %3 = vector.shape_cast %0 : vector<2x4x16x16xf32> to vector<2x1x4x16x16xf32>
    tpu.vector_store %arg2[%c0_3, %c0_4, %c0_5, %c0_6, %c0_7], %3 {strides = array<i32>} : memref<2x1x4x16x16xf32, #tpu.memory_space<vmem>>, vector<2x1x4x16x16xf32>,
    return
  }
  func.func @transform_0(%arg0: i32) -> (i32, i32, i32, i32) {
    %c0_i32 = arith.constant 0 : i32
    %c0_i32_0 = arith.constant 0 : i32
    %c0_i32_1 = arith.constant 0 : i32
    %c0_i32_2 = arith.constant 0 : i32
    %c0_i32_3 = arith.constant 0 : i32
    return %c0_i32, %c0_i32_0, %c0_i32_1, %c0_i32_2 : i32, i32, i32, i32
  }
  func.func @transform_1(%arg0: i32) -> (i32, i32, i32, i32, i32) {
    %c0_i32 = arith.constant 0 : i32
    %c0_i32_0 = arith.constant 0 : i32
    %c0_i32_1 = arith.constant 0 : i32
    %c0_i32_2 = arith.constant 0 : i32
    %c0_i32_3 = arith.constant 0 : i32
    %c0_i32_4 = arith.constant 0 : i32
    return %c0_i32, %c0_i32_0, %c0_i32_1, %c0_i32_2, %c0_i32_3 : i32, i32, i32, i32, i32
  }
}

</mosaic_0001>

<bundles_post_ra>
// kernel: unsqueeze_pallas.1
= control target key start
LH: loop header
LB: loop body
LE: loop exit
PB: predicated region body
PF: predicated region fallthrough
CT: control target
= control target key end

     0   :  { %6 = vsyncpa [#allocation3], 0  ;;  %s163_s0 = inlined_call_operand.hbm [shape: f32[2,4,16,16], index: 0, kind: input, shape index: {}]   ;;  %s164_s1 = inlined_call_operand.hbm [shape: f32[2,1,4,16,16], index: 1, kind: output, shape index: {}]  }
   0x1   :  { %7 = vsyncpa [#allocation4], 0  ;;  %s121_s6 = smov [#allocation2]  }
   0x2   :  { %s13_s7 = sshll.u32 %s121_s6, 4  ;;  %s14_s7 = int_to_ptr.vmem [resolvable:$true] %s13_s7 }
   0x3   :  { %s85_s8 = scalar_lea.vmem %s14_s7, 2048  ;;  %p90_p1 = scmp.lt.s32.totalorder %s14_s7, %s14_s7 }
   0x4   :  { %p86_p0 = scmp.ne.s32.totalorder %s14_s7, %s85_s8  ;;  %p91_p2 = scmp.lt.s32.totalorder %s85_s8, %s85_s8 }
   0x6   :  { %p92_p3 = por %p91_p2, %p90_p1 }
   0x8   :  { %p93_p4 = pnand %p92_p3, %p86_p0 }
   0xa   :  { %96 = shalt.err (!%p93_p4)
}
   0xb   :  { %s122_s9 = smov 128   ;;  %s123_s10 = smov 8  }
   0xc   :  { %19 = dma.hbm_to_vmem [thread:$0]  %s163_s0, 2048, %s14_s7, [#allocation3], %s122_s9, %s122_s9, %s123_s10  }
   0xd   :  { %117 = dma.done.wait [#allocation3], 2048  }
   0xe   :  { %118 = vsyncadd [#allocation3], 4294965248  ;;  %vm39_vm0 = vcmask 130048   ;;  %v23_v0 = vld [vmem:[#allocation2] sm:$0xff]  ;;  %v24_v1 = vld [vmem:[#allocation2 + $0x8] sm:$0xff]  ;;  %s124_s13 = smov [#allocation5]  }
   0xf   :  { %v25_v2 = vld [vmem:[#allocation2 + $0x10] sm:$0xff]  ;;  %40 = vst.msk [vmem:[#allocation5] sm:$0xff] %vm39_vm0, %v23_v0  ;;  %41 = vst.msk [vmem:[#allocation5 + $0x8] sm:$0xff] %vm39_vm0, %v24_v1  ;;  %v26_v3 = vld [vmem:[#allocation2 + $0x18] sm:$0xff]  ;;  %s61_s14 = sshll.u32 %s124_s13, 4  ;;  %s62_s14 = int_to_ptr.vmem [resolvable:$true] %s61_s14 }
  0x10   :  { %42 = vst.msk [vmem:[#allocation5 + $0x10] sm:$0xff] %vm39_vm0, %v25_v2  ;;  %v27_v4 = vld [vmem:[#allocation2 + $0x20] sm:$0xff]  ;;  %v28_v5 = vld [vmem:[#allocation2 + $0x28] sm:$0xff]  ;;  %43 = vst.msk [vmem:[#allocation5 + $0x18] sm:$0xff] %vm39_vm0, %v26_v3  ;;  %s97_s0 = scalar_lea.vmem %s62_s14, 2048  ;;  %p102_p6 = scmp.lt.s32.totalorder %s62_s14, %s62_s14 }
  0x11   :  { %44 = vst.msk [vmem:[#allocation5 + $0x20] sm:$0xff] %vm39_vm0, %v27_v4  ;;  %45 = vst.msk [vmem:[#allocation5 + $0x28] sm:$0xff] %vm39_vm0, %v28_v5  ;;  %v29_v6 = vld [vmem:[#allocation2 + $0x30] sm:$0xff]  ;;  %v30_v7 = vld [vmem:[#allocation2 + $0x38] sm:$0xff]  ;;  %p98_p5 = scmp.ne.s32.totalorder %s62_s14, %s97_s0  ;;  %p103_p7 = scmp.lt.s32.totalorder %s97_s0, %s97_s0 }
  0x12   :  { %v31_v8 = vld [vmem:[#allocation2 + $0x40] sm:$0xff]  ;;  %46 = vst.msk [vmem:[#allocation5 + $0x30] sm:$0xff] %vm39_vm0, %v29_v6  ;;  %47 = vst.msk [vmem:[#allocation5 + $0x38] sm:$0xff] %vm39_vm0, %v30_v7  ;;  %v32_v9 = vld [vmem:[#allocation2 + $0x48] sm:$0xff] }
  0x13   :  { %48 = vst.msk [vmem:[#allocation5 + $0x40] sm:$0xff] %vm39_vm0, %v31_v8  ;;  %v33_v10 = vld [vmem:[#allocation2 + $0x50] sm:$0xff]  ;;  %v34_v11 = vld [vmem:[#allocation2 + $0x58] sm:$0xff]  ;;  %49 = vst.msk [vmem:[#allocation5 + $0x48] sm:$0xff] %vm39_vm0, %v32_v9  ;;  %p104_p8 = por %p103_p7, %p102_p6 }
  0x14   :  { %50 = vst.msk [vmem:[#allocation5 + $0x50] sm:$0xff] %vm39_vm0, %v33_v10  ;;  %51 = vst.msk [vmem:[#allocation5 + $0x58] sm:$0xff] %vm39_vm0, %v34_v11  ;;  %v35_v12 = vld [vmem:[#allocation2 + $0x60] sm:$0xff]  ;;  %v36_v13 = vld [vmem:[#allocation2 + $0x68] sm:$0xff] }
  0x15   :  { %v37_v14 = vld [vmem:[#allocation2 + $0x70] sm:$0xff]  ;;  %52 = vst.msk [vmem:[#allocation5 + $0x60] sm:$0xff] %vm39_vm0, %v35_v12  ;;  %53 = vst.msk [vmem:[#allocation5 + $0x68] sm:$0xff] %vm39_vm0, %v36_v13  ;;  %v38_v15 = vld [vmem:[#allocation2 + $0x78] sm:$0xff]  ;;  %p105_p9 = pnand %p104_p8, %p98_p5 }
  0x16   :  { %54 = vst.msk [vmem:[#allocation5 + $0x70] sm:$0xff] %vm39_vm0, %v37_v14  ;;  %55 = vst.msk [vmem:[#allocation5 + $0x78] sm:$0xff] %vm39_vm0, %v38_v15 }
  0x17   :  { %108 = shalt.err (!%p105_p9)
}
  0x18   :  { %67 = dma.vmem_to_hbm [thread:$0]  %s62_s14, 2048, %s164_s1, [#allocation4], %s122_s9, %s122_s9, %s123_s10  }
  0x19   :  { %119 = dma.done.wait [#allocation4], 2048  }
  0x1a   :  { %120 = vsyncadd [#allocation4], 4294965248 }
  0x1b   :  { %71 = vsyncpa [#allocation3], 1 }
  0x1c   :  { %72 = vsyncpa [#allocation4], 1 }

</bundles_post_ra>
